<compile_context>
chip_gen: v7x
topology: tpu7x:2x2x1
jax: 0.10.0
libtpu: 0.0.40
codegen_flags: <defaults>
</compile_context>

<pallas_src>
import jax
import jax.numpy as jnp
from jax.experimental import pallas as pl
from jax.experimental.pallas import tpu as pltpu

EPS = 1e-5


def lr_tln_kernel(x_ref, w_ref, b_ref, g_ref, beta_ref, o_ref):
    # x_ref:    (TR, K)  row tile of flattened history (rows = batch*node pairs)
    # w_ref:    (K, M)   linear weight (torch W transposed -> K x M), resident
    # b_ref:    (1, M)   linear bias, resident
    # g_ref:    (1, M)   LayerNorm gamma, resident
    # beta_ref: (1, M)   LayerNorm beta, resident
    # o_ref:    (TR, M)  normalized prediction rows
    m = o_ref.shape[-1]
    inv_m = 1.0 / float(m)

    y = jnp.dot(x_ref[...], w_ref[...], preferred_element_type=jnp.float32)
    y = y + b_ref[...]                                    # (TR, M), broadcast bias

    # LayerNorm over the last dim (size M) per row -- two-pass (stable) form.
    mean = jnp.sum(y, axis=-1, keepdims=True) * inv_m     # (TR, 1)
    d = y - mean
    var = jnp.sum(d * d, axis=-1, keepdims=True) * inv_m  # biased variance (torch)
    inv = jax.lax.rsqrt(var + EPS)
    out = d * inv * g_ref[...] + beta_ref[...]
    o_ref[...] = out.astype(o_ref.dtype)


def _pick_row_tile(num_rows: int, requested: int = 512) -> int:
    """Row tile: multiple of 8, as large as useful, but >= 2 grid steps when possible."""
    tr = min(requested, max(8, num_rows))
    tr = max(8, (tr // 8) * 8)
    # Keep at least 2 parallel grid steps so a 2-TensorCore chip splits the work.
    if num_rows >= 16 and pl.cdiv(num_rows, tr) < 2:
        tr = max(8, ((num_rows // 2) // 8) * 8)
    return tr


def lr_tln_forward(long_history_data, w, b, gamma, beta,
                   prediction_seq_len, output_dim, row_tile=512):
    """long_history_data: [B, L, N, C]; returns [B, P, N, O]."""
    B, L, N, C = long_history_data.shape
    K = L * C
    M = prediction_seq_len * output_dim
    R = B * N

    # Wrapper glue: [B, L, N, C] -> [B, N, L, C] -> [R, K]
    x = jnp.transpose(long_history_data, (0, 2, 1, 3)).reshape(R, K)

    # Pre-shape / pre-cast parameters once (no per-grid-step casts in-kernel).
    w_f = w.astype(jnp.float32)
    b_f = b.reshape(1, M).astype(jnp.float32)
    g_f = gamma.reshape(1, M).astype(jnp.float32)
    beta_f = beta.reshape(1, M).astype(jnp.float32)

    tr = _pick_row_tile(R, row_tile)
    n_steps = pl.cdiv(R, tr)
    R_pad = n_steps * tr
    if R_pad != R:
        # Zero-padded rows produce finite garbage (var=0 -> rsqrt(eps)); sliced off below.
        x = jnp.pad(x, ((0, R_pad - R), (0, 0)))

    out2d = pl.pallas_call(
        lr_tln_kernel,
        out_shape=jax.ShapeDtypeStruct((R_pad, M), x.dtype),
        grid_spec=pltpu.PrefetchScalarGridSpec(
            num_scalar_prefetch=0,
            grid=(n_steps,),
            in_specs=[
                pl.BlockSpec((tr, K), lambda i: (i, 0)),   # streamed row tiles
                pl.BlockSpec((K, M), lambda i: (0, 0)),    # resident weight
                pl.BlockSpec((1, M), lambda i: (0, 0)),    # resident bias
                pl.BlockSpec((1, M), lambda i: (0, 0)),    # resident gamma
                pl.BlockSpec((1, M), lambda i: (0, 0)),    # resident beta
            ],
            out_specs=pl.BlockSpec((tr, M), lambda i: (i, 0)),
        ),
        compiler_params=pltpu.CompilerParams(
            dimension_semantics=("parallel",),
            vmem_limit_bytes=48 << 20,
        ),
    )(x, w_f, b_f, g_f, beta_f)

    out2d = out2d[:R]
    # Glue: [R, M] -> [B, N, P, O] -> [B, P, N, O]
    out = out2d.reshape(B, N, prediction_seq_len, output_dim)
    return jnp.transpose(out, (0, 2, 1, 3))


def reference_forward(long_history_data, w, b, gamma, beta,
                      prediction_seq_len, output_dim):
    B, L, N, C = long_history_data.shape
    x = jnp.transpose(long_history_data, (0, 2, 1, 3)).reshape(B, N, L * C)
    y = jnp.einsum("bnk,km->bnm", x, w,
                   precision=jax.lax.Precision.HIGHEST) + b[None, None, :]
    mean = jnp.mean(y, axis=-1, keepdims=True)
    var = jnp.mean((y - mean) ** 2, axis=-1, keepdims=True)
    yn = (y - mean) / jnp.sqrt(var + EPS)
    out = yn * gamma[None, None, :] + beta[None, None, :]
    out = out.reshape(B, N, prediction_seq_len, output_dim)
    return jnp.transpose(out, (0, 2, 1, 3))


if __name__ == "__main__":
    # Small, forward-consistent shapes
    B = 2                   # batch
    history_seq_len = 12    # L (long history length)
    num_nodes = 8           # N
    input_dim = 2           # C
    prediction_seq_len = 4  # P
    output_dim = 2          # O

    K = history_seq_len * input_dim         # 24
    M = prediction_seq_len * output_dim     # 8

    key = jax.random.PRNGKey(0)
    k_x, k_w, k_b, k_g, k_beta = jax.random.split(key, 5)

    long_history_data = jax.random.normal(
        k_x, (B, history_seq_len, num_nodes, input_dim), dtype=jnp.float32)

    # Synthetic parameters: single-layer MLP (Linear K->M) + affine LayerNorm(M)
    w = jax.random.normal(k_w, (K, M), dtype=jnp.float32) * (1.0 / jnp.sqrt(K))
    b = jax.random.normal(k_b, (M,), dtype=jnp.float32) * 0.1
    gamma = 1.0 + 0.1 * jax.random.normal(k_g, (M,), dtype=jnp.float32)
    beta = 0.1 * jax.random.normal(k_beta, (M,), dtype=jnp.float32)

    out = lr_tln_forward(long_history_data, w, b, gamma, beta,
                         prediction_seq_len, output_dim)
    out = jax.block_until_ready(out)

    ref = reference_forward(long_history_data, w, b, gamma, beta,
                            prediction_seq_len, output_dim)

    assert out.shape == (B, prediction_seq_len, num_nodes, output_dim), out.shape
    assert jnp.allclose(out, ref, atol=1e-4, rtol=1e-4), "mismatch vs reference"

    print("KERNEL_OK")
</pallas_src>

<mosaic_0001>
module attributes {stable_mosaic.version = 11 : i64} {
  func.func @lr_tln_kernel(%arg0: i32, %arg1: memref<8x24xf32, #tpu.memory_space<vmem>>, %arg2: memref<24x8xf32, #tpu.memory_space<vmem>>, %arg3: memref<1x8xf32, #tpu.memory_space<vmem>>, %arg4: memref<1x8xf32, #tpu.memory_space<vmem>>, %arg5: memref<1x8xf32, #tpu.memory_space<vmem>>, %arg6: memref<8x8xf32, #tpu.memory_space<vmem>>) attributes {dimension_semantics = [#tpu.dimension_semantics<parallel>], iteration_bounds = array<i64: 2>, scalar_prefetch = 0 : i64, scratch_operands = 0 : i64, tpu.core_type = #tpu.core_type<tc>, window_params = [{transform_indices = @transform_0, window_bounds = array<i64: 8, 24>}, {pipeline_mode = #tpu.pipeline_mode<synchronous>, transform_indices = @transform_1, window_bounds = array<i64: 24, 8>}, {pipeline_mode = #tpu.pipeline_mode<synchronous>, transform_indices = @transform_2, window_bounds = array<i64: 1, 8>}, {pipeline_mode = #tpu.pipeline_mode<synchronous>, transform_indices = @transform_3, window_bounds = array<i64: 1, 8>}, {pipeline_mode = #tpu.pipeline_mode<synchronous>, transform_indices = @transform_4, window_bounds = array<i64: 1, 8>}, {transform_indices = @transform_5, window_bounds = array<i64: 8, 8>}]} {
    %c0 = arith.constant 0 : index
    %c0_0 = arith.constant 0 : index
    %0 = vector.load %arg1[%c0, %c0_0] : memref<8x24xf32, #tpu.memory_space<vmem>>, vector<8x24xf32>
    %c0_1 = arith.constant 0 : index
    %c0_2 = arith.constant 0 : index
    %1 = vector.load %arg2[%c0_1, %c0_2] : memref<24x8xf32, #tpu.memory_space<vmem>>, vector<24x8xf32>
    %cst = arith.constant dense<0.000000e+00> : vector<8x8xf32>
    %2 = tpu.matmul %0, %1, %cst {dimension_numbers = #tpu.dot_dimension_numbers<[1], [0], [0], [1], [0, 0, 1, 1], [], []>} : vector<8x24xf32>, vector<24x8xf32>, vector<8x8xf32> -> vector<8x8xf32>
    %c0_3 = arith.constant 0 : index
    %c0_4 = arith.constant 0 : index
    %3 = vector.load %arg3[%c0_3, %c0_4] : memref<1x8xf32, #tpu.memory_space<vmem>>, vector<1x8xf32>
    %4 = vector.broadcast %3 : vector<1x8xf32> to vector<8x8xf32>
    %5 = arith.addf %2, %4 : vector<8x8xf32>
    %cst_5 = arith.constant dense<0.000000e+00> : vector<8xf32>
    %6 = vector.multi_reduction <add>, %5, %cst_5 [1] : vector<8x8xf32> to vector<8xf32>
    %7 = vector.shape_cast %6 : vector<8xf32> to vector<8x1xf32>
    %cst_6 = arith.constant 1.250000e-01 : f32
    %8 = vector.broadcast %cst_6 : f32 to vector<8x1xf32>
    %9 = arith.mulf %7, %8 : vector<8x1xf32>
    %10 = vector.broadcast %9 : vector<8x1xf32> to vector<8x8xf32>
    %11 = arith.subf %5, %10 : vector<8x8xf32>
    %12 = arith.mulf %11, %11 : vector<8x8xf32>
    %cst_7 = arith.constant dense<0.000000e+00> : vector<8xf32>
    %13 = vector.multi_reduction <add>, %12, %cst_7 [1] : vector<8x8xf32> to vector<8xf32>
    %14 = vector.shape_cast %13 : vector<8xf32> to vector<8x1xf32>
    %cst_8 = arith.constant 1.250000e-01 : f32
    %15 = vector.broadcast %cst_8 : f32 to vector<8x1xf32>
    %16 = arith.mulf %14, %15 : vector<8x1xf32>
    %cst_9 = arith.constant 9.99999974E-6 : f32
    %17 = vector.broadcast %cst_9 : f32 to vector<8x1xf32>
    %18 = arith.addf %16, %17 : vector<8x1xf32>
    %19 = math.rsqrt %18 : vector<8x1xf32>
    %20 = vector.broadcast %19 : vector<8x1xf32> to vector<8x8xf32>
    %21 = arith.mulf %11, %20 : vector<8x8xf32>
    %c0_10 = arith.constant 0 : index
    %c0_11 = arith.constant 0 : index
    %22 = vector.load %arg4[%c0_10, %c0_11] : memref<1x8xf32, #tpu.memory_space<vmem>>, vector<1x8xf32>
    %23 = vector.broadcast %22 : vector<1x8xf32> to vector<8x8xf32>
    %24 = arith.mulf %21, %23 : vector<8x8xf32>
    %c0_12 = arith.constant 0 : index
    %c0_13 = arith.constant 0 : index
    %25 = vector.load %arg5[%c0_12, %c0_13] : memref<1x8xf32, #tpu.memory_space<vmem>>, vector<1x8xf32>
    %26 = vector.broadcast %25 : vector<1x8xf32> to vector<8x8xf32>
    %27 = arith.addf %24, %26 : vector<8x8xf32>
    %c0_14 = arith.constant 0 : index
    %c0_15 = arith.constant 0 : index
    %28 = vector.load %arg6[%c0_14, %c0_15] : memref<8x8xf32, #tpu.memory_space<vmem>>, vector<8x8xf32>
    tpu.vector_store %arg6[%c0_14, %c0_15], %27 {strides = array<i32>} : memref<8x8xf32, #tpu.memory_space<vmem>>, vector<8x8xf32>,
    return
  }
  func.func @transform_0(%arg0: i32) -> (i32, i32) {
    %c0_i32 = arith.constant 0 : i32
    %c0_i32_0 = arith.constant 0 : i32
    return %arg0, %c0_i32 : i32, i32
  }
  func.func @transform_1(%arg0: i32) -> (i32, i32) {
    %c0_i32 = arith.constant 0 : i32
    %c0_i32_0 = arith.constant 0 : i32
    %c0_i32_1 = arith.constant 0 : i32
    return %c0_i32, %c0_i32_0 : i32, i32
  }
  func.func @transform_2(%arg0: i32) -> (i32, i32) {
    %c0_i32 = arith.constant 0 : i32
    %c0_i32_0 = arith.constant 0 : i32
    %c0_i32_1 = arith.constant 0 : i32
    return %c0_i32, %c0_i32_0 : i32, i32
  }
  func.func @transform_3(%arg0: i32) -> (i32, i32) {
    %c0_i32 = arith.constant 0 : i32
    %c0_i32_0 = arith.constant 0 : i32
    %c0_i32_1 = arith.constant 0 : i32
    return %c0_i32, %c0_i32_0 : i32, i32
  }
  func.func @transform_4(%arg0: i32) -> (i32, i32) {
    %c0_i32 = arith.constant 0 : i32
    %c0_i32_0 = arith.constant 0 : i32
    %c0_i32_1 = arith.constant 0 : i32
    return %c0_i32, %c0_i32_0 : i32, i32
  }
  func.func @transform_5(%arg0: i32) -> (i32, i32) {
    %c0_i32 = arith.constant 0 : i32
    %c0_i32_0 = arith.constant 0 : i32
    return %arg0, %c0_i32 : i32, i32
  }
}

</mosaic_0001>

<bundles_post_ra>
// kernel: tpu_custom_call.1
= control target key start
LH: loop header
LB: loop body
LE: loop exit
PB: predicated region body
PF: predicated region fallthrough
CT: control target
= control target key end

     0   :  { %s472_s18 = smov 0   ;;  %s513_s0 = inlined_call_operand.vmem [shape: f32[16,24], index: 0, kind: input, shape index: {}]   ;;  %s514_s1 = inlined_call_operand.vmem [shape: f32[24,8], index: 1, kind: input, shape index: {}]   ;;  %s515_s2 = inlined_call_operand.vmem [shape: f32[1,8], index: 2, kind: input, shape index: {}]   ;;  %s516_s3 = inlined_call_operand.vmem [shape: f32[1,8], index: 3, kind: input, shape index: {}]   ;;  %s517_s4 = inlined_call_operand.vmem [shape: f32[1,8], index: 4, kind: input, shape index: {}]   ;;  %s518_s5 = inlined_call_operand.vmem [shape: f32[16,8], index: 5, kind: output, shape index: {}]  }
   0x1 LB: > { %s389_s19 = sadd.s32 4294967295, %s437_s18   ;;  %p393_p0 = scmp.ge.s32.totalorder %s437_s18, 1  ;;  %s437_s18 = sphi %s472_s18, %s15_s18  }
   0x2   : > { %p186_p1 = scmp.lt.s32.totalorder %s437_s18, 3 }
   0x4   : > { %p187_p2 = pnand %p393_p0, %p186_p1 }
   0x5   : > { %v221_v0 = vld [vmem:[%s514_s1] sm:$0xff] (!%p187_p2)  ;;  %v222_v1 = vld [vmem:[%s514_s1 + $0x8] sm:$0xff] (!%p187_p2)  ;;  %v439_v2 = vmov (!%p187_p2), 0.0|0.0   ;;  %vm440_vm0 = vmmov (!%p187_p2), 0   ;;  %v441_v4 = vmov (!%p187_p2), 0.0   ;;  %p212_p3 = scmp.lt.s32.totalorder (!%p187_p2), %s389_s19, 1 }
   0x6   : > { %190 = sbr.rel (%p187_p2) target bundleno = 545 (0x221), region = 40  ;;  %415 = vmatprep.subr.bf16.mxu0 (!%p187_p2), %v439_v2  ;;  %v416_v3 = vpack.c.bf16 (!%p187_p2), %v222_v1, %v221_v0  ;;  %412 = vmatprep.mubr.msk.f32.mxu0 (!%p187_p2), %vm440_vm0, %v441_v4  ;;  %v223_v5 = vld [vmem:[%s514_s1 + $0x10] sm:$0xff] (!%p187_p2)  ;;  %vm231_vm1 = vcmask (!%p187_p2), 195584   ;;  %v396_v7 = vld [vmem:[%s515_s2] ss:$0 sm:$0xff] (!%p187_p2)  ;;  %vm305_vm2 = vcmask (!%p187_p2), 64512  }
   0x7   : > { %v398_v21 = vld [vmem:[%s516_s3] ss:$0 sm:$0xff] (!%p187_p2) }
   0x8   : > { %417 = vmatpush3.bf16.msra.mxu0 (!%p187_p2), %v416_v3  ;;  %v399_v23 = vld [vmem:[%s517_s4] ss:$0 sm:$0xff] (!%p187_p2) }
   0x9   : > { %410 = vmatprep.subr.mxu0 (!%p187_p2), %v441_v4 }
   0xc   : > { %411 = vmatpush3.msra.mxu0 (!%p187_p2), %v223_v5 }
   0xd   : > { %s520_s19 = smov (!%p212_p3, %s389_s19), 1 }
   0xe   : > { %s394_s26 = sshll.u32 %s520_s19, 3 }
   0xf   : > { %s215_s29 = scalar_lea.vmem %s513_s0, %s394_s26  ;;  %s219_s13 = scalar_lea.vmem %s518_s5, %s394_s26 }
  0x10   : > { %v220_v6 = vld [vmem:[%s215_s29] sm:$0xff] }
  0x11   : > { %413 = vmatmul.mubr.msk.f32.vlgmr.msra.gmra.mrb[0].mxu0 %vm231_vm1, %v220_v6 }
  0xe4   : > { %v301_v8 = vpop.f32.mrb[0].mxu0 }
  0xe5   : > { %v302_v9 = vadd.f32 %v396_v7, %v301_v8  ;;  %v414_v10 = vpop.f32.mrb[1].mxu0 }
  0xe7   : > { %v306_v11 = vsel %vm305_vm2, %v302_v9, 0.0 }
  0xe8   : > { %307 = vadd.xlane.f32.xlu0 %v306_v11 }
 0x175   : > { %v308_v12 = vpop.xlane.xlu0 %307 }
 0x176   : > { %v309_v13 = vmul.f32 0.125, %v308_v12 }
 0x178   : > { %v310_v14 = vsub.f32 %v302_v9, %v309_v13 }
 0x17a   : > { %v311_v15 = vmul.f32 %v310_v14, %v310_v14 }
 0x17c   : > { %v312_v16 = vsel %vm305_vm2, %v311_v15, 0.0 }
 0x17d   : > { %313 = vadd.xlane.f32.xlu0 %v312_v16 }
 0x20a   : > { %v314_v17 = vpop.xlane.xlu0 %313 }
 0x20b   : > { %v315_v18 = vmul.f32 0.125, %v314_v17 }
 0x20d   : > { %v316_v19 = vadd.f32 1e-05, %v315_v18 }
 0x20f   : > { %429 = vrsqrt.f32 %v316_v19 }
 0x219   : > { %v430_v20 = vpop.eup %429 }
 0x21a   : > { %v318_v22 = vmul.f32 %v430_v20, %v310_v14 }
 0x21c   : > { %v326_v24 = vmul.f32 %v398_v21, %v318_v22 }
 0x21e   : > { %v334_v25 = vadd.f32 %v399_v23, %v326_v24 }
 0x220   : > { %335 = vst.msk [vmem:[%s219_s13] sm:$0xff] %vm305_vm2, %v334_v25 }
 0x221 PF: > { %s15_s18 = sadd.s32 1, %s437_s18  }
 0x222   : > { %p12_p4 = scmp.ge.s32.totalorder %s15_s18, 4  }
 0x224   :  { %14 = sbr.rel (!%p12_p4) target bundleno = 1 (0x1), region = 70 }

</bundles_post_ra>
